<compile_context>
chip_gen: v7x
topology: tpu7x:2x2x1
jax: 0.10.0
libtpu: 0.0.40
codegen_flags: <defaults>
</compile_context>

<pallas_src>
import jax
import jax.numpy as jnp
from jax.experimental import pallas as pl
from jax.experimental.pallas import tpu as pltpu

_LANE = 128      # TPU lane width
_SUBLANE = 8     # TPU sublane width


def qnetwork_kernel(x_ref, w1_ref, b1_ref, w2_ref, b2_ref, w3_ref, b3_ref,
                    q_ref):
    # fc1 + ReLU   (TB, S) @ (S, 128) -> (TB, 128)
    h1 = jnp.dot(x_ref[...], w1_ref[...], preferred_element_type=jnp.float32)
    h1 = jnp.maximum(h1 + b1_ref[...], 0.0)
    # fc2 + ReLU   (TB, 128) @ (128, 128) -> (TB, 128)
    h2 = jnp.dot(h1, w2_ref[...], preferred_element_type=jnp.float32)
    h2 = jnp.maximum(h2 + b2_ref[...], 0.0)
    # fc3 (no activation); lane-dense (TB, out_pad) store
    q = jnp.dot(h2, w3_ref[...], preferred_element_type=jnp.float32)
    q_ref[...] = (q + b3_ref[...]).astype(q_ref.dtype)


def _round_up(n, m):
    return ((n + m - 1) // m) * m


def qnetwork_forward(x, params, *, block_batch=1024):
    """x: (B, state_size) float32; params dict with w1,b1,w2,b2,w3,b3.

    Weights are (in_features, out_features); biases are (out_features,).
    Returns (B, action_size) float32 Q-values.
    """
    w1, b1, w2, b2, w3, b3 = (params["w1"], params["b1"], params["w2"],
                              params["b2"], params["w3"], params["b3"])
    B, state_size = x.shape
    hidden = w1.shape[1]
    action_size = w3.shape[1]

    # ---- lane-dense padding of the tiny feature dims (done on weights only,
    #      so the batch-sized HBM traffic for x / q is unchanged).
    hid_pad = _round_up(hidden, _LANE)
    out_pad = _round_up(action_size, _LANE)

    w1p = jnp.zeros((state_size, hid_pad), jnp.float32)
    w1p = w1p.at[:, :hidden].set(w1.astype(jnp.float32))
    b1p = jnp.zeros((1, hid_pad), jnp.float32).at[0, :hidden].set(b1)

    w2p = jnp.zeros((hid_pad, hid_pad), jnp.float32)
    w2p = w2p.at[:hidden, :hidden].set(w2.astype(jnp.float32))
    b2p = jnp.zeros((1, hid_pad), jnp.float32).at[0, :hidden].set(b2)

    w3p = jnp.zeros((hid_pad, out_pad), jnp.float32)
    w3p = w3p.at[:hidden, :action_size].set(w3.astype(jnp.float32))
    b3p = jnp.zeros((1, out_pad), jnp.float32).at[0, :action_size].set(b3)

    # ---- batch tiling: TB multiple of 8 sublanes; pad batch rows with zeros.
    tb = min(int(block_batch), _round_up(B, _SUBLANE))
    tb = _round_up(tb, _SUBLANE)
    b_padded = _round_up(B, tb)
    xp = x if b_padded == B else jnp.pad(x, ((0, b_padded - B), (0, 0)))

    grid = (b_padded // tb,)

    # Weights/biases: full-array blocks, constant index_map -> VMEM-resident.
    resident = lambda a: pl.BlockSpec(a.shape, lambda i: (0,) * a.ndim)

    q_padded = pl.pallas_call(
        qnetwork_kernel,
        out_shape=jax.ShapeDtypeStruct((b_padded, out_pad), jnp.float32),
        grid=grid,
        in_specs=[
            pl.BlockSpec((tb, state_size), lambda i: (i, 0)),   # x: batch-tiled
            resident(w1p), resident(b1p),
            resident(w2p), resident(b2p),
            resident(w3p), resident(b3p),
        ],
        out_specs=pl.BlockSpec((tb, out_pad), lambda i: (i, 0)),
        compiler_params=pltpu.CompilerParams(
            dimension_semantics=("parallel",),   # shard batch tiles across TCs (v7x)
            vmem_limit_bytes=64 * 1024 * 1024,
        ),
    )(xp, w1p, b1p, w2p, b2p, w3p, b3p)

    # Slice off padded batch rows and padded (zero) action columns.
    return q_padded[:B, :action_size]


def init_qnetwork_params(key, state_size, action_size, hidden=64):
    """Deterministic init mimicking torch.nn.Linear default:
    U(-1/sqrt(fan_in), 1/sqrt(fan_in)) for both weights and biases."""
    keys = jax.random.split(key, 6)

    def linear(kw, kb, fan_in, fan_out):
        bound = 1.0 / jnp.sqrt(fan_in)
        w = jax.random.uniform(kw, (fan_in, fan_out), jnp.float32,
                               minval=-bound, maxval=bound)
        b = jax.random.uniform(kb, (fan_out,), jnp.float32,
                               minval=-bound, maxval=bound)
        return w, b

    w1, b1 = linear(keys[0], keys[1], state_size, hidden)
    w2, b2 = linear(keys[2], keys[3], hidden, hidden)
    w3, b3 = linear(keys[4], keys[5], hidden, action_size)
    return dict(w1=w1, b1=b1, w2=w2, b2=b2, w3=w3, b3=b3)


def qnetwork_reference(x, p):
    """Plain-JAX reference for correctness check."""
    h1 = jnp.maximum(x @ p["w1"] + p["b1"], 0.0)
    h2 = jnp.maximum(h1 @ p["w2"] + p["b2"], 0.0)
    return h2 @ p["w3"] + p["b3"]


if __name__ == "__main__":
    key = jax.random.PRNGKey(0)
    k_param, k_x1, k_x2 = jax.random.split(key, 3)

    batch = 8
    state_size = 8
    action_size = 4

    params = init_qnetwork_params(k_param, state_size, action_size)

    # Small online-inference-style batch (single grid step).
    x = jax.random.normal(k_x1, (batch, state_size), jnp.float32)
    q = jax.block_until_ready(qnetwork_forward(x, params))
    q_ref = qnetwork_reference(x, params)
    assert q.shape == (batch, action_size)
    assert jnp.allclose(q, q_ref, atol=1e-5, rtol=1e-5), "mismatch vs reference"

    # Larger, non-multiple-of-tile batch: exercises the batch grid + padding.
    big_batch = 200
    xb = jax.random.normal(k_x2, (big_batch, state_size), jnp.float32)
    qb = jax.block_until_ready(qnetwork_forward(xb, params, block_batch=64))
    qb_ref = qnetwork_reference(xb, params)
    assert qb.shape == (big_batch, action_size)
    assert jnp.allclose(qb, qb_ref, atol=1e-5, rtol=1e-5), "mismatch (batched)"

    print("KERNEL_OK")
</pallas_src>

<mosaic_0001>
module attributes {stable_mosaic.version = 11 : i64} {
  func.func @qnetwork_kernel(%arg0: i32, %arg1: memref<8x8xf32, #tpu.memory_space<vmem>>, %arg2: memref<8x128xf32, #tpu.memory_space<vmem>>, %arg3: memref<1x128xf32, #tpu.memory_space<vmem>>, %arg4: memref<128x128xf32, #tpu.memory_space<vmem>>, %arg5: memref<1x128xf32, #tpu.memory_space<vmem>>, %arg6: memref<128x128xf32, #tpu.memory_space<vmem>>, %arg7: memref<1x128xf32, #tpu.memory_space<vmem>>, %arg8: memref<8x128xf32, #tpu.memory_space<vmem>>) attributes {dimension_semantics = [#tpu.dimension_semantics<parallel>], iteration_bounds = array<i64: 1>, scalar_prefetch = 0 : i64, scratch_operands = 0 : i64, tpu.core_type = #tpu.core_type<tc>, window_params = [{transform_indices = @transform_0, window_bounds = array<i64: 8, 8>}, {pipeline_mode = #tpu.pipeline_mode<synchronous>, transform_indices = @transform_1, window_bounds = array<i64: 8, 128>}, {pipeline_mode = #tpu.pipeline_mode<synchronous>, transform_indices = @transform_2, window_bounds = array<i64: 1, 128>}, {pipeline_mode = #tpu.pipeline_mode<synchronous>, transform_indices = @transform_3, window_bounds = array<i64: 128, 128>}, {pipeline_mode = #tpu.pipeline_mode<synchronous>, transform_indices = @transform_4, window_bounds = array<i64: 1, 128>}, {pipeline_mode = #tpu.pipeline_mode<synchronous>, transform_indices = @transform_5, window_bounds = array<i64: 128, 128>}, {pipeline_mode = #tpu.pipeline_mode<synchronous>, transform_indices = @transform_6, window_bounds = array<i64: 1, 128>}, {transform_indices = @transform_7, window_bounds = array<i64: 8, 128>}]} {
    %c0 = arith.constant 0 : index
    %c0_0 = arith.constant 0 : index
    %0 = vector.load %arg1[%c0, %c0_0] : memref<8x8xf32, #tpu.memory_space<vmem>>, vector<8x8xf32>
    %c0_1 = arith.constant 0 : index
    %c0_2 = arith.constant 0 : index
    %1 = vector.load %arg2[%c0_1, %c0_2] : memref<8x128xf32, #tpu.memory_space<vmem>>, vector<8x128xf32>
    %cst = arith.constant dense<0.000000e+00> : vector<8x128xf32>
    %2 = tpu.matmul %0, %1, %cst {dimension_numbers = #tpu.dot_dimension_numbers<[1], [0], [0], [1], [0, 0, 1, 1], [], []>} : vector<8x8xf32>, vector<8x128xf32>, vector<8x128xf32> -> vector<8x128xf32>
    %c0_3 = arith.constant 0 : index
    %c0_4 = arith.constant 0 : index
    %3 = vector.load %arg3[%c0_3, %c0_4] : memref<1x128xf32, #tpu.memory_space<vmem>>, vector<1x128xf32>
    %4 = vector.broadcast %3 : vector<1x128xf32> to vector<8x128xf32>
    %5 = arith.addf %2, %4 : vector<8x128xf32>
    %cst_5 = arith.constant 0.000000e+00 : f32
    %6 = vector.broadcast %cst_5 : f32 to vector<8x128xf32>
    %7 = arith.maximumf %5, %6 : vector<8x128xf32>
    %c0_6 = arith.constant 0 : index
    %c0_7 = arith.constant 0 : index
    %8 = vector.load %arg4[%c0_6, %c0_7] : memref<128x128xf32, #tpu.memory_space<vmem>>, vector<128x128xf32>
    %cst_8 = arith.constant dense<0.000000e+00> : vector<8x128xf32>
    %9 = tpu.matmul %7, %8, %cst_8 {dimension_numbers = #tpu.dot_dimension_numbers<[1], [0], [0], [1], [0, 0, 1, 1], [], []>} : vector<8x128xf32>, vector<128x128xf32>, vector<8x128xf32> -> vector<8x128xf32>
    %c0_9 = arith.constant 0 : index
    %c0_10 = arith.constant 0 : index
    %10 = vector.load %arg5[%c0_9, %c0_10] : memref<1x128xf32, #tpu.memory_space<vmem>>, vector<1x128xf32>
    %11 = vector.broadcast %10 : vector<1x128xf32> to vector<8x128xf32>
    %12 = arith.addf %9, %11 : vector<8x128xf32>
    %cst_11 = arith.constant 0.000000e+00 : f32
    %13 = vector.broadcast %cst_11 : f32 to vector<8x128xf32>
    %14 = arith.maximumf %12, %13 : vector<8x128xf32>
    %c0_12 = arith.constant 0 : index
    %c0_13 = arith.constant 0 : index
    %15 = vector.load %arg6[%c0_12, %c0_13] : memref<128x128xf32, #tpu.memory_space<vmem>>, vector<128x128xf32>
    %cst_14 = arith.constant dense<0.000000e+00> : vector<8x128xf32>
    %16 = tpu.matmul %14, %15, %cst_14 {dimension_numbers = #tpu.dot_dimension_numbers<[1], [0], [0], [1], [0, 0, 1, 1], [], []>} : vector<8x128xf32>, vector<128x128xf32>, vector<8x128xf32> -> vector<8x128xf32>
    %c0_15 = arith.constant 0 : index
    %c0_16 = arith.constant 0 : index
    %17 = vector.load %arg7[%c0_15, %c0_16] : memref<1x128xf32, #tpu.memory_space<vmem>>, vector<1x128xf32>
    %18 = vector.broadcast %17 : vector<1x128xf32> to vector<8x128xf32>
    %19 = arith.addf %16, %18 : vector<8x128xf32>
    %c0_17 = arith.constant 0 : index
    %c0_18 = arith.constant 0 : index
    %20 = vector.load %arg8[%c0_17, %c0_18] : memref<8x128xf32, #tpu.memory_space<vmem>>, vector<8x128xf32>
    tpu.vector_store %arg8[%c0_17, %c0_18], %19 {strides = array<i32>} : memref<8x128xf32, #tpu.memory_space<vmem>>, vector<8x128xf32>,
    return
  }
  func.func @transform_0(%arg0: i32) -> (i32, i32) {
    %c0_i32 = arith.constant 0 : i32
    %c0_i32_0 = arith.constant 0 : i32
    return %arg0, %c0_i32 : i32, i32
  }
  func.func @transform_1(%arg0: i32) -> (i32, i32) {
    %c0_i32 = arith.constant 0 : i32
    %c0_i32_0 = arith.constant 0 : i32
    %c0_i32_1 = arith.constant 0 : i32
    return %c0_i32, %c0_i32_0 : i32, i32
  }
  func.func @transform_2(%arg0: i32) -> (i32, i32) {
    %c0_i32 = arith.constant 0 : i32
    %c0_i32_0 = arith.constant 0 : i32
    %c0_i32_1 = arith.constant 0 : i32
    return %c0_i32, %c0_i32_0 : i32, i32
  }
  func.func @transform_3(%arg0: i32) -> (i32, i32) {
    %c0_i32 = arith.constant 0 : i32
    %c0_i32_0 = arith.constant 0 : i32
    %c0_i32_1 = arith.constant 0 : i32
    return %c0_i32, %c0_i32_0 : i32, i32
  }
  func.func @transform_4(%arg0: i32) -> (i32, i32) {
    %c0_i32 = arith.constant 0 : i32
    %c0_i32_0 = arith.constant 0 : i32
    %c0_i32_1 = arith.constant 0 : i32
    return %c0_i32, %c0_i32_0 : i32, i32
  }
  func.func @transform_5(%arg0: i32) -> (i32, i32) {
    %c0_i32 = arith.constant 0 : i32
    %c0_i32_0 = arith.constant 0 : i32
    %c0_i32_1 = arith.constant 0 : i32
    return %c0_i32, %c0_i32_0 : i32, i32
  }
  func.func @transform_6(%arg0: i32) -> (i32, i32) {
    %c0_i32 = arith.constant 0 : i32
    %c0_i32_0 = arith.constant 0 : i32
    %c0_i32_1 = arith.constant 0 : i32
    return %c0_i32, %c0_i32_0 : i32, i32
  }
  func.func @transform_7(%arg0: i32) -> (i32, i32) {
    %c0_i32 = arith.constant 0 : i32
    %c0_i32_0 = arith.constant 0 : i32
    return %arg0, %c0_i32 : i32, i32
  }
}

</mosaic_0001>

<bundles_post_ra>
// kernel: tpu_custom_call.1
= control target key start
LH: loop header
LB: loop body
LE: loop exit
PB: predicated region body
PF: predicated region fallthrough
CT: control target
= control target key end

     0   :  { %12 = vsyncpa [#allocation3], 0  ;;  %s939_s0 = inlined_call_operand.hbm [shape: f32[8,8], index: 0, kind: input, shape index: {}]   ;;  %s940_s1 = inlined_call_operand.hbm [shape: f32[8,128], index: 1, kind: input, shape index: {}]   ;;  %s941_s2 = inlined_call_operand.hbm [shape: f32[1,128], index: 2, kind: input, shape index: {}]   ;;  %s942_s3 = inlined_call_operand.hbm [shape: f32[128,128], index: 3, kind: input, shape index: {}]   ;;  %s943_s4 = inlined_call_operand.hbm [shape: f32[1,128], index: 4, kind: input, shape index: {}]   ;;  %s944_s5 = inlined_call_operand.hbm [shape: f32[128,128], index: 5, kind: input, shape index: {}]   ;;  %s945_s6 = inlined_call_operand.hbm [shape: f32[1,128], index: 6, kind: input, shape index: {}]   ;;  %s946_s7 = inlined_call_operand.hbm [shape: f32[8,128], index: 7, kind: output, shape index: {}]  }
   0x1   :  { %13 = vsyncpa [#allocation6], 0 }
   0x2   :  { %14 = vsyncpa [#allocation9], 0 }
   0x3   :  { %15 = vsyncpa [#allocation12], 0 }
   0x4   :  { %16 = vsyncpa [#allocation4], 0  ;;  %s764_s24 = smov [#allocation5]   ;;  %s765_s26 = smov [#allocation8]  }
   0x5   :  { %s33_s25 = sshll.u32 %s764_s24, 4  ;;  %s52_s27 = sshll.u32 %s765_s26, 4  ;;  %s34_s25 = int_to_ptr.vmem [resolvable:$true] %s33_s25  ;;  %s817_s27 = int_to_ptr.vmem [resolvable:$true] %s52_s27 }
   0x6   :  { %s578_s30 = scalar_lea.hbm %s940_s1, 128 }
   0x7   :  { %p579_p0 = scmp.ne.s32.totalorder %s940_s1, %s578_s30  ;;  %p582_p1 = scmp.lt.u32.totalorder %s578_s30, %s940_s1 }
   0x9   :  { %p584_p2 = pnand %p582_p1, %p579_p0 }
   0xb   :  { %587 = shalt.err (!%p584_p2)
}
   0xc   :  { %s588_s12 = scalar_lea.vmem %s34_s25, 128  ;;  %p593_p4 = scmp.lt.s32.totalorder %s34_s25, %s34_s25 }
   0xd   :  { %p589_p3 = scmp.ne.s32.totalorder %s34_s25, %s588_s12  ;;  %p594_p5 = scmp.lt.s32.totalorder %s588_s12, %s588_s12 }
   0xf   :  { %p595_p6 = por %p594_p5, %p593_p4 }
  0x11   :  { %p596_p7 = pnand %p595_p6, %p589_p3 }
  0x13   :  { %599 = shalt.err (!%p596_p7)
}
  0x14   :  { %36 = dma.hbm_to_vmem [thread:$0]  %s940_s1, 128, %s34_s25, [#allocation6]  }
  0x15   :  { %s600_s17 = scalar_lea.hbm %s942_s3, 2048 }
  0x16   :  { %p601_p8 = scmp.ne.s32.totalorder %s942_s3, %s600_s17  ;;  %p604_p9 = scmp.lt.u32.totalorder %s600_s17, %s942_s3 }
  0x18   :  { %p606_p10 = pnand %p604_p9, %p601_p8 }
  0x1a   :  { %609 = shalt.err (!%p606_p10)
}
  0x1b   :  { %s610_s22 = scalar_lea.vmem %s817_s27, 2048  ;;  %p615_p12 = scmp.lt.s32.totalorder %s817_s27, %s817_s27 }
  0x1c   :  { %p611_p11 = scmp.ne.s32.totalorder %s817_s27, %s610_s22  ;;  %p616_p13 = scmp.lt.s32.totalorder %s610_s22, %s610_s22 }
  0x1e   :  { %p617_p0 = por %p616_p13, %p615_p12 }
  0x20   :  { %p618_p1 = pnand %p617_p0, %p611_p11 }
  0x22   :  { %621 = shalt.err (!%p618_p1)
}
  0x23   :  { %s766_s1 = smov 128   ;;  %s767_s23 = smov 8  }
  0x24   :  { %58 = dma.hbm_to_vmem [thread:$0]  %s942_s3, 2048, %s817_s27, [#allocation9], %s766_s1, %s766_s1, %s767_s23  }
  0x25   :  { %s768_s26 = smov [#allocation11]   ;;  %s769_s29 = smov [#allocation2]  }
  0x26   :  { %s74_s28 = sshll.u32 %s768_s26, 4  ;;  %s23_s30 = sshll.u32 %s769_s29, 4  ;;  %s75_s28 = int_to_ptr.vmem [resolvable:$true] %s74_s28  ;;  %s24_s30 = int_to_ptr.vmem [resolvable:$true] %s23_s30 }
  0x27   :  { %s622_s10 = scalar_lea.hbm %s944_s5, 2048 }
  0x28   :  { %p623_p2 = scmp.ne.s32.totalorder %s944_s5, %s622_s10  ;;  %p626_p3 = scmp.lt.u32.totalorder %s622_s10, %s944_s5 }
  0x2a   :  { %p628_p4 = pnand %p626_p3, %p623_p2 }
  0x2c   :  { %631 = shalt.err (!%p628_p4)
}
  0x2d   :  { %s632_s3 = scalar_lea.vmem %s75_s28, 2048  ;;  %p637_p6 = scmp.lt.s32.totalorder %s75_s28, %s75_s28 }
  0x2e   :  { %p633_p5 = scmp.ne.s32.totalorder %s75_s28, %s632_s3  ;;  %p638_p7 = scmp.lt.s32.totalorder %s632_s3, %s632_s3 }
  0x30   :  { %p639_p8 = por %p638_p7, %p637_p6 }
  0x32   :  { %p640_p9 = pnand %p639_p8, %p633_p5 }
  0x34   :  { %643 = shalt.err (!%p640_p9)
}
  0x35   :  { %80 = dma.hbm_to_vmem [thread:$0]  %s944_s5, 2048, %s75_s28, [#allocation12], %s766_s1, %s766_s1, %s767_s23  }
  0x36   :  { %s644_s18 = scalar_lea.hbm %s939_s0, 128 }
  0x37   :  { %p645_p10 = scmp.ne.s32.totalorder %s939_s0, %s644_s18  ;;  %p648_p11 = scmp.lt.u32.totalorder %s644_s18, %s939_s0 }
  0x39   :  { %p650_p12 = pnand %p648_p11, %p645_p10 }
  0x3b   :  { %653 = shalt.err (!%p650_p12)
}
  0x3c   :  { %s654_s24 = scalar_lea.vmem %s24_s30, 128  ;;  %p659_p0 = scmp.lt.s32.totalorder %s24_s30, %s24_s30 }
  0x3d   :  { %p655_p13 = scmp.ne.s32.totalorder %s24_s30, %s654_s24  ;;  %p660_p1 = scmp.lt.s32.totalorder %s654_s24, %s654_s24 }
  0x3f   :  { %p661_p2 = por %p660_p1, %p659_p0 }
  0x41   :  { %p662_p3 = pnand %p661_p2, %p655_p13 }
  0x43   :  { %665 = shalt.err (!%p662_p3)
}
  0x44   :  { %26 = dma.hbm_to_vmem [thread:$0]  %s939_s0, 128, %s24_s30, [#allocation3]  }
  0x45   :  { %s770_s23 = smov [#allocation7]   ;;  %s771_s26 = smov [#allocation10]  }
  0x46   :  { %s43_s25 = sshll.u32 %s770_s23, 4  ;;  %s65_s28 = sshll.u32 %s771_s26, 4  ;;  %s44_s25 = int_to_ptr.vmem [resolvable:$true] %s43_s25  ;;  %s66_s28 = int_to_ptr.vmem [resolvable:$true] %s65_s28 }
  0x47   :  { %s666_s9 = scalar_lea.hbm %s941_s2, 16 }
  0x48   :  { %p667_p4 = scmp.ne.s32.totalorder %s941_s2, %s666_s9  ;;  %p670_p5 = scmp.lt.u32.totalorder %s666_s9, %s941_s2 }
  0x4a   :  { %p672_p6 = pnand %p670_p5, %p667_p4 }
  0x4c   :  { %675 = shalt.err (!%p672_p6)
}
  0x4d   :  { %s676_s0 = scalar_lea.vmem %s44_s25, 16  ;;  %s680_s30 = scalar_lea.vmem %s44_s25, 32 }
  0x4e   :  { %p677_p7 = scmp.ne.s32.totalorder %s44_s25, %s676_s0  ;;  %p681_p8 = scmp.lt.s32.totalorder %s44_s25, %s44_s25 }
  0x4f   :  { %p682_p9 = scmp.lt.s32.totalorder %s680_s30, %s676_s0 }
  0x51   :  { %p683_p10 = por %p682_p9, %p681_p8 }
  0x53   :  { %p684_p11 = pnand %p683_p10, %p677_p7 }
  0x55   :  { %687 = shalt.err (!%p684_p11)
}
  0x56   :  { %46 = dma.hbm_to_vmem [thread:$0]  %s941_s2, 16, %s44_s25, [#allocation6]  }
  0x57   :  { %s688_s16 = scalar_lea.hbm %s943_s4, 16 }
  0x58   :  { %p689_p12 = scmp.ne.s32.totalorder %s943_s4, %s688_s16  ;;  %p692_p13 = scmp.lt.u32.totalorder %s688_s16, %s943_s4 }
  0x5a   :  { %p694_p0 = pnand %p692_p13, %p689_p12 }
  0x5c   :  { %697 = shalt.err (!%p694_p0)
}
  0x5d   :  { %s698_s21 = scalar_lea.vmem %s66_s28, 16  ;;  %s702_s22 = scalar_lea.vmem %s66_s28, 32 }
  0x5e   :  { %p699_p1 = scmp.ne.s32.totalorder %s66_s28, %s698_s21  ;;  %p703_p2 = scmp.lt.s32.totalorder %s66_s28, %s66_s28 }
  0x5f   :  { %p704_p3 = scmp.lt.s32.totalorder %s702_s22, %s698_s21 }
  0x61   :  { %p705_p4 = por %p704_p3, %p703_p2 }
  0x63   :  { %p706_p5 = pnand %p705_p4, %p699_p1 }
  0x65   :  { %709 = shalt.err (!%p706_p5)
}
  0x66   :  { %68 = dma.hbm_to_vmem [thread:$0]  %s943_s4, 16, %s66_s28, [#allocation9]  }
  0x67   :  { %s772_s5 = smov [#allocation13]   ;;  %s710_s26 = scalar_lea.hbm %s945_s6, 16 }
  0x68   :  { %s87_s1 = sshll.u32 %s772_s5, 4  ;;  %p711_p6 = scmp.ne.s32.totalorder %s945_s6, %s710_s26  ;;  %s88_s1 = int_to_ptr.vmem [resolvable:$true] %s87_s1 }
  0x69   :  { %p714_p7 = scmp.lt.u32.totalorder %s710_s26, %s945_s6 }
  0x6b   :  { %p716_p8 = pnand %p714_p7, %p711_p6 }
  0x6d   :  { %719 = shalt.err (!%p716_p8)
}
  0x6e   :  { %s720_s11 = scalar_lea.vmem %s88_s1, 16  ;;  %s724_s4 = scalar_lea.vmem %s88_s1, 32 }
  0x6f   :  { %p721_p9 = scmp.ne.s32.totalorder %s88_s1, %s720_s11  ;;  %p725_p10 = scmp.lt.s32.totalorder %s88_s1, %s88_s1 }
  0x70   :  { %p726_p11 = scmp.lt.s32.totalorder %s724_s4, %s720_s11 }
  0x72   :  { %p727_p12 = por %p726_p11, %p725_p10 }
  0x74   :  { %p728_p13 = pnand %p727_p12, %p721_p9 }
  0x76   :  { %731 = shalt.err (!%p728_p13)
}
  0x77   :  { %90 = dma.hbm_to_vmem [thread:$0]  %s945_s6, 16, %s88_s1, [#allocation12]  }
  0x78   :  { %754 = dma.done.wait [#allocation3], 128  }
  0x79   :  { %755 = vsyncadd [#allocation3], 4294967168 }
  0x7a   :  { %756 = dma.done.wait [#allocation6], 144  }
  0x7b   :  { %757 = vsyncadd [#allocation6], 4294967152 }
  0x7c   :  { %758 = dma.done.wait [#allocation9], 2064  }
  0x7d   :  { %759 = vsyncadd [#allocation9], 4294965232 }
  0x7e   :  { %760 = dma.done.wait [#allocation12], 2064  }
  0x7f   :  { %761 = vsyncadd [#allocation12], 4294965232  ;;  %v773_v0 = vmov 0.0   ;;  %vm774_vm0 = vmmov 0   ;;  %v775_v1 = vmov 0.0|0.0   ;;  %vm121_vm1 = vcmask 64512  }
  0x80   :  { %442 = vmatprep.subr.mxu0 %v773_v0  ;;  %444 = vmatprep.mubr.msk.f32.mxu0 %vm774_vm0, %v773_v0  ;;  %v113_v2 = vld [vmem:[#allocation5] sm:$0xff]  ;;  %v112_v3 = vld [vmem:[#allocation2] sm:$0xff]  ;;  %v196_v4 = vld [vmem:[#allocation8] sm:$0xff]  ;;  %s776_s6 = smov [#allocation14]  }
  0x81   :  { %517 = vmatprep.subr.bf16.mxu1 %v775_v1  ;;  %479 = vmatprep.mubr.msk.f32.mxu1 %vm774_vm0, %v773_v0  ;;  %v197_v5 = vld [vmem:[#allocation8 + $0x8] sm:$0xff]  ;;  %v198_v6 = vld [vmem:[#allocation8 + $0x10] sm:$0xff]  ;;  %v199_v7 = vld [vmem:[#allocation8 + $0x18] sm:$0xff]  ;;  %s390_s13 = sshll.u32 %s776_s6, 4  ;;  %s391_s13 = int_to_ptr.vmem [resolvable:$true] %s390_s13 }
  0x82   :  { %443 = vmatpush3.msra.mxu0 %v113_v2  ;;  %v518_v8 = vpack.c.bf16 %v197_v5, %v196_v4  ;;  %v521_v9 = vpack.c.bf16 %v199_v7, %v198_v6  ;;  %v200_v10 = vld [vmem:[#allocation8 + $0x20] sm:$0xff]  ;;  %v201_v11 = vld [vmem:[#allocation8 + $0x28] sm:$0xff]  ;;  %v202_v13 = vld [vmem:[#allocation8 + $0x30] sm:$0xff]  ;;  %s732_s0 = scalar_lea.vmem %s391_s13, 128  ;;  %p737_p1 = scmp.lt.s32.totalorder %s391_s13, %s391_s13 }
  0x83   :  { %445 = vmatmul.mubr.msk.f32.vlgmr.msra.gmra.mrb[0].mxu0 %vm121_vm1, %v112_v3  ;;  %541 = vmatprep.subr.bf16.mxu0 %v775_v1  ;;  %v524_v12 = vpack.c.bf16 %v201_v11, %v200_v10  ;;  %v203_v14 = vld [vmem:[#allocation8 + $0x38] sm:$0xff]  ;;  %v204_v16 = vld [vmem:[#allocation8 + $0x40] sm:$0xff]  ;;  %v205_v17 = vld [vmem:[#allocation8 + $0x48] sm:$0xff]  ;;  %p733_p0 = scmp.ne.s32.totalorder %s391_s13, %s732_s0  ;;  %p738_p2 = scmp.lt.s32.totalorder %s732_s0, %s732_s0 }
  0x84   :  { %514 = vmatprep.mubr.msk.f32.mxu0 %vm774_vm0, %v773_v0  ;;  %519 = vmatpush3.bf16.msra.mxu1 %v518_v8  ;;  %v527_v15 = vpack.c.bf16 %v203_v14, %v202_v13  ;;  %v530_v18 = vpack.c.bf16 %v205_v17, %v204_v16  ;;  %v206_v19 = vld [vmem:[#allocation8 + $0x50] sm:$0xff]  ;;  %v207_v20 = vld [vmem:[#allocation8 + $0x58] sm:$0xff]  ;;  %v208_v22 = vld [vmem:[#allocation8 + $0x60] sm:$0xff] }
  0x85   :  { %520 = vmatprep.subr.bf16.mxu1 %v775_v1  ;;  %v533_v21 = vpack.c.bf16 %v207_v20, %v206_v19  ;;  %v209_v23 = vld [vmem:[#allocation8 + $0x68] sm:$0xff]  ;;  %v210_v25 = vld [vmem:[#allocation8 + $0x70] sm:$0xff]  ;;  %v211_v26 = vld [vmem:[#allocation8 + $0x78] sm:$0xff]  ;;  %p739_p3 = por %p738_p2, %p737_p1 }
  0x86   :  { %v536_v24 = vpack.c.bf16 %v209_v23, %v208_v22  ;;  %v539_v27 = vpack.c.bf16 %v211_v26, %v210_v25  ;;  %v290_v28 = vld [vmem:[#allocation11] sm:$0xff]  ;;  %v291_v29 = vld [vmem:[#allocation11 + $0x8] sm:$0xff]  ;;  %v292_v30 = vld [vmem:[#allocation11 + $0x10] sm:$0xff] }
  0x87   :  { %v542_v31 = vpack.c.bf16 %v291_v29, %v290_v28  ;;  %v293_v32 = vld [vmem:[#allocation11 + $0x18] sm:$0xff]  ;;  %v294_v34 = vld [vmem:[#allocation11 + $0x20] sm:$0xff]  ;;  %v295_v35 = vld [vmem:[#allocation11 + $0x28] sm:$0xff]  ;;  %p740_p4 = pnand %p739_p3, %p733_p0 }
  0x88   :  { %522 = vmatpush3.bf16.msra.mxu1 %v521_v9  ;;  %v545_v33 = vpack.c.bf16 %v293_v32, %v292_v30  ;;  %v548_v36 = vpack.c.bf16 %v295_v35, %v294_v34  ;;  %v296_v37 = vld [vmem:[#allocation11 + $0x30] sm:$0xff]  ;;  %v297_v38 = vld [vmem:[#allocation11 + $0x38] sm:$0xff]  ;;  %v298_v40 = vld [vmem:[#allocation11 + $0x40] sm:$0xff] }
  0x89   :  { %523 = vmatprep.subr.bf16.mxu1 %v775_v1  ;;  %543 = vmatpush3.bf16.msra.mxu0 %v542_v31  ;;  %v551_v39 = vpack.c.bf16 %v297_v38, %v296_v37  ;;  %v299_v41 = vld [vmem:[#allocation11 + $0x48] sm:$0xff]  ;;  %v300_v43 = vld [vmem:[#allocation11 + $0x50] sm:$0xff]  ;;  %v301_v44 = vld [vmem:[#allocation11 + $0x58] sm:$0xff] }
  0x8a   :  { %544 = vmatprep.subr.bf16.mxu0 %v775_v1  ;;  %v554_v42 = vpack.c.bf16 %v299_v41, %v298_v40  ;;  %v557_v45 = vpack.c.bf16 %v301_v44, %v300_v43  ;;  %v302_v46 = vld [vmem:[#allocation11 + $0x60] sm:$0xff]  ;;  %v303_v47 = vld [vmem:[#allocation11 + $0x68] sm:$0xff]  ;;  %v402_v49 = vld [vmem:[#allocation7] ss:$0 sm:$0xff] }
  0x8b   :  { %v560_v48 = vpack.c.bf16 %v303_v47, %v302_v46  ;;  %v304_v54 = vld [vmem:[#allocation11 + $0x70] sm:$0xff]  ;;  %v305_v55 = vld [vmem:[#allocation11 + $0x78] sm:$0xff]  ;;  %v405_v62 = vld [vmem:[#allocation13] ss:$0 sm:$0xff] }
  0x8c   :  { %525 = vmatpush3.bf16.msra.mxu1 %v524_v12  ;;  %v563_v56 = vpack.c.bf16 %v305_v55, %v304_v54  ;;  %v404_v57 = vld [vmem:[#allocation10] ss:$0 sm:$0xff] }
  0x8d   :  { %526 = vmatprep.subr.bf16.mxu1 %v775_v1  ;;  %546 = vmatpush3.bf16.msra.mxu0 %v545_v33 }
  0x8e   :  { %547 = vmatprep.subr.bf16.mxu0 %v775_v1 }
  0x90   :  { %528 = vmatpush3.bf16.msra.mxu1 %v527_v15 }
  0x91   :  { %529 = vmatprep.subr.bf16.mxu1 %v775_v1  ;;  %549 = vmatpush3.bf16.msra.mxu0 %v548_v36 }
  0x92   :  { %550 = vmatprep.subr.bf16.mxu0 %v775_v1 }
  0x94   :  { %531 = vmatpush3.bf16.msra.mxu1 %v530_v18 }
  0x95   :  { %532 = vmatprep.subr.bf16.mxu1 %v775_v1  ;;  %552 = vmatpush3.bf16.msra.mxu0 %v551_v39 }
  0x96   :  { %553 = vmatprep.subr.bf16.mxu0 %v775_v1 }
  0x98   :  { %534 = vmatpush3.bf16.msra.mxu1 %v533_v21 }
  0x99   :  { %535 = vmatprep.subr.bf16.mxu1 %v775_v1  ;;  %555 = vmatpush3.bf16.msra.mxu0 %v554_v42 }
  0x9a   :  { %556 = vmatprep.subr.bf16.mxu0 %v775_v1 }
  0x9c   :  { %537 = vmatpush3.bf16.msra.mxu1 %v536_v24 }
  0x9d   :  { %538 = vmatprep.subr.bf16.mxu1 %v775_v1  ;;  %558 = vmatpush3.bf16.msra.mxu0 %v557_v45 }
  0x9e   :  { %559 = vmatprep.subr.bf16.mxu0 %v775_v1 }
  0xa0   :  { %540 = vmatpush3.bf16.msra.mxu1 %v539_v27 }
  0xa1   :  { %561 = vmatpush3.bf16.msra.mxu0 %v560_v48 }
  0xa2   :  { %562 = vmatprep.subr.bf16.mxu0 %v775_v1 }
  0xa5   :  { %564 = vmatpush3.bf16.msra.mxu0 %v563_v56 }
 0x156   :  { %v191_v50 = vpop.f32.mrb[0].mxu0 }
 0x157   :  { %v192_v51 = vadd.f32 %v402_v49, %v191_v50  ;;  %v446_v52 = vpop.f32.mrb[1].mxu0 }
 0x159   :  { %v195_v53 = vmax.f32 %v192_v51, 0.0 }
 0x15b   :  { %480 = vmatmul.mubr.f32.vlgmr.msra.gmra.mrb[0].mxu1 %v195_v53 }
 0x22e   :  { %v285_v58 = vpop.f32.mrb[0].mxu1 }
 0x22f   :  { %v286_v59 = vadd.f32 %v404_v57, %v285_v58  ;;  %v481_v60 = vpop.f32.mrb[1].mxu1 }
 0x231   :  { %v289_v61 = vmax.f32 %v286_v59, 0.0 }
 0x233   :  { %515 = vmatmul.mubr.f32.vlgmr.msra.gmra.mrb[2].mxu0 %v289_v61 }
 0x306   :  { %v379_v63 = vpop.f32.mrb[2].mxu0 }
 0x307   :  { %v380_v0 = vadd.f32 %v405_v62, %v379_v63  ;;  %v516_v1 = vpop.f32.mrb[3].mxu0 }
 0x309   :  { %383 = vst [vmem:[#allocation14] sm:$0xff] %v380_v0 }
 0x30a   :  { %743 = shalt.err (!%p740_p4)
}
 0x30b   :  { %s744_s3 = scalar_lea.hbm %s946_s7, 128 }
 0x30c   :  { %p745_p5 = scmp.ne.s32.totalorder %s946_s7, %s744_s3  ;;  %p748_p6 = scmp.lt.u32.totalorder %s744_s3, %s946_s7 }
 0x30e   :  { %p750_p7 = pnand %p748_p6, %p745_p5 }
 0x310   :  { %753 = shalt.err (!%p750_p7)
}
 0x311   :  { %393 = dma.vmem_to_hbm [thread:$0]  %s391_s13, 128, %s946_s7, [#allocation4]  }
 0x312   :  { %762 = dma.done.wait [#allocation4], 128  }
 0x313   :  { %763 = vsyncadd [#allocation4], 4294967168 }
 0x314   :  { %397 = vsyncpa [#allocation3], 1 }
 0x315   :  { %398 = vsyncpa [#allocation6], 1 }
 0x316   :  { %399 = vsyncpa [#allocation9], 1 }
 0x317   :  { %400 = vsyncpa [#allocation12], 1 }
 0x318   :  { %401 = vsyncpa [#allocation4], 1 }

</bundles_post_ra>
